<compile_context>
chip_gen: v7x
topology: tpu7x:2x2x1
jax: 0.10.0
libtpu: 0.0.40
codegen_flags: <defaults>
</compile_context>

<pallas_src>
import jax
import jax.numpy as jnp
from jax.experimental import pallas as pl
from jax.experimental.pallas import tpu as pltpu


# ----------------------------- Pallas kernel ------------------------------ #

def dino_views_kernel(xm_ref, wc_ref, bc_ref,
                      w1_ref, b1_ref, w2_ref, b2_ref, w3_ref, b3_ref,
                      o_ref):
    # grid axis 0 = view index; this block holds that view's pooled patches.
    xm = xm_ref[0]                                                   # [B, K]

    # ---- shared backbone (student/teacher share wc/bc): computed once ------
    feats = jnp.dot(xm, wc_ref[...],
                    preferred_element_type=jnp.float32) + bc_ref[...]  # [B, F]

    # ---- both MLP_DINO heads at once (lane-stacked: student | teacher) -----
    h1 = jnp.maximum(
        jnp.dot(feats, w1_ref[...], preferred_element_type=jnp.float32)
        + b1_ref[...], 0.0)                                          # [B, 2H]
    h2 = jnp.maximum(
        jnp.dot(h1, w2_ref[...], preferred_element_type=jnp.float32)
        + b2_ref[...], 0.0)                                          # [B, 2H]
    z = jnp.dot(h2, w3_ref[...],
                preferred_element_type=jnp.float32) + b3_ref[...]    # [B, 2O]

    out_dim = z.shape[-1] // 2

    def _l2_normalize(v):
        # F.normalize(v, dim=-1) == v / max(||v||, 1e-12)
        #                        == v * rsqrt(max(sum(v*v), 1e-24))
        ss = jnp.sum(v * v, axis=-1, keepdims=True)
        return v * jax.lax.rsqrt(jnp.maximum(ss, 1e-24))

    zs = _l2_normalize(z[:, :out_dim])        # student head, this view
    zt = _l2_normalize(z[:, out_dim:])        # teacher head, this view
    o_ref[0] = jnp.concatenate([zs, zt], axis=-1)                    # [B, 2O]


def dino_views_forward(xm_views, packed):
    """xm_views: [2, B, K] pooled patches (view1, view2). Returns [2, B, 2*O]."""
    _, B, K = xm_views.shape
    F_dim = packed["wc"].shape[1]
    H2 = packed["w1"].shape[1]        # 2 * hidden_dim (lane-stacked heads)
    O2 = packed["w3"].shape[1]        # 2 * out_dim

    return pl.pallas_call(
        dino_views_kernel,
        out_shape=jax.ShapeDtypeStruct((2, B, O2), jnp.float32),
        grid=(2,),
        in_specs=[
            pl.BlockSpec((1, B, K), lambda v: (v, 0, 0)),      # pooled patches
            pl.BlockSpec((K, F_dim), lambda v: (0, 0)),        # wc (resident)
            pl.BlockSpec((1, F_dim), lambda v: (0, 0)),        # bc
            pl.BlockSpec((F_dim, H2), lambda v: (0, 0)),       # w1 (stacked)
            pl.BlockSpec((1, H2), lambda v: (0, 0)),           # b1
            pl.BlockSpec((H2, H2), lambda v: (0, 0)),          # w2 (block-diag)
            pl.BlockSpec((1, H2), lambda v: (0, 0)),           # b2
            pl.BlockSpec((H2, O2), lambda v: (0, 0)),          # w3 (block-diag)
            pl.BlockSpec((1, O2), lambda v: (0, 0)),           # b3
        ],
        out_specs=pl.BlockSpec((1, B, O2), lambda v: (v, 0, 0)),
        compiler_params=pltpu.CompilerParams(
            dimension_semantics=("parallel",)),   # v7x: views split across TCs
    )(xm_views, packed["wc"], packed["bc"],
      packed["w1"], packed["b1"], packed["w2"], packed["b2"],
      packed["w3"], packed["b3"])


# ------------------------------- glue (JAX) -------------------------------- #

def patchify(x_nchw, patch):
    """NCHW image -> [B, Np, C*P*P] patch matrix (PyTorch conv flattening)."""
    B, C, H, W = x_nchw.shape
    x = x_nchw.reshape(B, C, H // patch, patch, W // patch, patch)
    x = x.transpose(0, 2, 4, 1, 3, 5)          # [B, Hp, Wp, C, P, P]
    return x.reshape(B, (H // patch) * (W // patch), C * patch * patch)


def patch_mean(x_nchw, patch):
    """Global-average-pooled patch vector [B, C*P*P] (hoisted out of kernel)."""
    return jnp.mean(patchify(x_nchw, patch), axis=1)


def _init_linear(key, in_dim, out_dim):
    kw, kb = jax.random.split(key)
    bound = 1.0 / jnp.sqrt(jnp.float32(in_dim))
    w = jax.random.uniform(kw, (out_dim, in_dim), jnp.float32, -bound, bound)
    b = jax.random.uniform(kb, (out_dim,), jnp.float32, -bound, bound)
    return w, b


def _weight_norm_effective(v, g):
    """nn.utils.weight_norm: w = g * v / ||v||, row-wise (dim=0)."""
    row_norm = jnp.sqrt(jnp.sum(v * v, axis=1, keepdims=True))
    return v * (g[:, None] / row_norm)


def init_dino_params(key, in_channels=3, patch=4, in_dim=32,
                     hidden_dim=64, out_dim=32):
    kbb, ksh, kth = jax.random.split(key, 3)

    # backbone (shared init): Conv2d(C, in_dim, P, stride=P) as a linear map
    K = in_channels * patch * patch
    wc_t, bc = _init_linear(kbb, K, in_dim)     # torch layout [out, in]
    backbone = {"wc": wc_t.T, "bc": bc.reshape(1, in_dim)}

    def init_head(k):
        k1, k2, k3 = jax.random.split(k, 3)
        w1, b1 = _init_linear(k1, in_dim, hidden_dim)
        w2, b2 = _init_linear(k2, hidden_dim, hidden_dim)
        v3, b3 = _init_linear(k3, hidden_dim, out_dim)
        # torch weight_norm init: g = ||v|| per output row -> w == v at init
        g3 = jnp.sqrt(jnp.sum(v3 * v3, axis=1))
        w3 = _weight_norm_effective(v3, g3)
        return {"w1": w1.T, "b1": b1.reshape(1, -1),
                "w2": w2.T, "b2": b2.reshape(1, -1),
                "w3": w3.T, "b3": b3.reshape(1, -1)}

    # teacher backbone is a deepcopy of the student backbone -> same params;
    # the two heads are independently initialized.
    student = {**backbone, **init_head(ksh)}
    teacher = {**backbone, **init_head(kth)}
    return student, teacher, patch


def _block_diag(a, b):
    top = jnp.concatenate([a, jnp.zeros((a.shape[0], b.shape[1]), a.dtype)], 1)
    bot = jnp.concatenate([jnp.zeros((b.shape[0], a.shape[1]), b.dtype), b], 1)
    return jnp.concatenate([top, bot], axis=0)


def pack_dino_params(student, teacher):
    """Lane-stack the two heads so both run as single 128-wide matmuls.

    w1: [F, 2H] (student | teacher cols); w2: [2H, 2H] block-diag;
    w3: [2H, 2O] block-diag; biases concatenated. Backbone wc/bc is shared.
    """
    return {
        "wc": student["wc"], "bc": student["bc"],
        "w1": jnp.concatenate([student["w1"], teacher["w1"]], axis=1),
        "b1": jnp.concatenate([student["b1"], teacher["b1"]], axis=1),
        "w2": _block_diag(student["w2"], teacher["w2"]),
        "b2": jnp.concatenate([student["b2"], teacher["b2"]], axis=1),
        "w3": _block_diag(student["w3"], teacher["w3"]),
        "b3": jnp.concatenate([student["b3"], teacher["b3"]], axis=1),
    }


def dino_forward(x1, x2, packed, patch):
    """Returns (s1, s2, t1, t2) exactly like DINO.forward, in ONE kernel call."""
    # patch-mean hoisted out of the kernel (Np x less kernel input traffic)
    xm = jnp.stack([patch_mean(x1, patch), patch_mean(x2, patch)], axis=0)
    out = dino_views_forward(xm, packed)          # [2, B, 2*O]
    O = out.shape[-1] // 2
    s1, t1 = out[0, :, :O], out[0, :, O:]
    s2, t2 = out[1, :, :O], out[1, :, O:]
    return s1, s2, t1, t2
    # For large batches: add a batch-tile grid axis (multiple of 8 rows) with
    # constant weight index_maps; on v6e/v7x the head weights could be bf16
    # with the normalize kept in f32.


# pure-JAX reference (per branch, per view) for correctness checking
def _ref_branch(x_patches, kp):
    xm = jnp.mean(x_patches, axis=1)
    feats = xm @ kp["wc"] + kp["bc"]
    h1 = jnp.maximum(feats @ kp["w1"] + kp["b1"], 0.0)
    h2 = jnp.maximum(h1 @ kp["w2"] + kp["b2"], 0.0)
    z = h2 @ kp["w3"] + kp["b3"]
    n = jnp.sqrt(jnp.sum(z * z, axis=-1, keepdims=True))
    return z / jnp.maximum(n, 1e-12)


if __name__ == "__main__":
    key = jax.random.PRNGKey(0)
    kx1, kx2, kparam = jax.random.split(key, 3)

    B, C, H, W = 2, 3, 16, 16
    x1 = jax.random.normal(kx1, (B, C, H, W), jnp.float32)   # NCHW, like torch
    x2 = jax.random.normal(kx2, (B, C, H, W), jnp.float32)

    student, teacher, patch = init_dino_params(
        kparam, in_channels=C, patch=4, in_dim=32, hidden_dim=64, out_dim=32)
    packed = pack_dino_params(student, teacher)

    s1, s2, t1, t2 = dino_forward(x1, x2, packed, patch)
    jax.block_until_ready((s1, s2, t1, t2))

    # sanity check vs plain-JAX reference (unpacked params, per branch/view)
    p1, p2 = patchify(x1, patch), patchify(x2, patch)
    assert jnp.allclose(s1, _ref_branch(p1, student), atol=1e-4, rtol=1e-4)
    assert jnp.allclose(s2, _ref_branch(p2, student), atol=1e-4, rtol=1e-4)
    assert jnp.allclose(t1, _ref_branch(p1, teacher), atol=1e-4, rtol=1e-4)
    assert jnp.allclose(t2, _ref_branch(p2, teacher), atol=1e-4, rtol=1e-4)

    print("KERNEL_OK")
</pallas_src>

<mosaic_0001>
module attributes {stable_mosaic.version = 11 : i64} {
  func.func @dino_views_kernel(%arg0: i32, %arg1: memref<1x2x48xf32, #tpu.memory_space<vmem>>, %arg2: memref<48x32xf32, #tpu.memory_space<vmem>>, %arg3: memref<1x32xf32, #tpu.memory_space<vmem>>, %arg4: memref<32x128xf32, #tpu.memory_space<vmem>>, %arg5: memref<1x128xf32, #tpu.memory_space<vmem>>, %arg6: memref<128x128xf32, #tpu.memory_space<vmem>>, %arg7: memref<1x128xf32, #tpu.memory_space<vmem>>, %arg8: memref<128x64xf32, #tpu.memory_space<vmem>>, %arg9: memref<1x64xf32, #tpu.memory_space<vmem>>, %arg10: memref<1x2x64xf32, #tpu.memory_space<vmem>>) attributes {dimension_semantics = [#tpu.dimension_semantics<parallel>], iteration_bounds = array<i64: 2>, scalar_prefetch = 0 : i64, scratch_operands = 0 : i64, tpu.core_type = #tpu.core_type<tc>, window_params = [{transform_indices = @transform_0, window_bounds = array<i64: 1, 2, 48>}, {pipeline_mode = #tpu.pipeline_mode<synchronous>, transform_indices = @transform_1, window_bounds = array<i64: 48, 32>}, {pipeline_mode = #tpu.pipeline_mode<synchronous>, transform_indices = @transform_2, window_bounds = array<i64: 1, 32>}, {pipeline_mode = #tpu.pipeline_mode<synchronous>, transform_indices = @transform_3, window_bounds = array<i64: 32, 128>}, {pipeline_mode = #tpu.pipeline_mode<synchronous>, transform_indices = @transform_4, window_bounds = array<i64: 1, 128>}, {pipeline_mode = #tpu.pipeline_mode<synchronous>, transform_indices = @transform_5, window_bounds = array<i64: 128, 128>}, {pipeline_mode = #tpu.pipeline_mode<synchronous>, transform_indices = @transform_6, window_bounds = array<i64: 1, 128>}, {pipeline_mode = #tpu.pipeline_mode<synchronous>, transform_indices = @transform_7, window_bounds = array<i64: 128, 64>}, {pipeline_mode = #tpu.pipeline_mode<synchronous>, transform_indices = @transform_8, window_bounds = array<i64: 1, 64>}, {transform_indices = @transform_9, window_bounds = array<i64: 1, 2, 64>}]} {
    %c0 = arith.constant 0 : index
    %c0_0 = arith.constant 0 : index
    %c0_1 = arith.constant 0 : index
    %0 = vector.load %arg1[%c0, %c0_0, %c0_1] : memref<1x2x48xf32, #tpu.memory_space<vmem>>, vector<1x2x48xf32>
    %1 = vector.shape_cast %0 : vector<1x2x48xf32> to vector<2x48xf32>
    %c0_2 = arith.constant 0 : index
    %c0_3 = arith.constant 0 : index
    %2 = vector.load %arg2[%c0_2, %c0_3] : memref<48x32xf32, #tpu.memory_space<vmem>>, vector<48x32xf32>
    %cst = arith.constant dense<0.000000e+00> : vector<2x32xf32>
    %3 = tpu.matmul %1, %2, %cst {dimension_numbers = #tpu.dot_dimension_numbers<[1], [0], [0], [1], [0, 0, 1, 1], [], []>} : vector<2x48xf32>, vector<48x32xf32>, vector<2x32xf32> -> vector<2x32xf32>
    %c0_4 = arith.constant 0 : index
    %c0_5 = arith.constant 0 : index
    %4 = vector.load %arg3[%c0_4, %c0_5] : memref<1x32xf32, #tpu.memory_space<vmem>>, vector<1x32xf32>
    %5 = vector.broadcast %4 : vector<1x32xf32> to vector<2x32xf32>
    %6 = arith.addf %3, %5 : vector<2x32xf32>
    %c0_6 = arith.constant 0 : index
    %c0_7 = arith.constant 0 : index
    %7 = vector.load %arg4[%c0_6, %c0_7] : memref<32x128xf32, #tpu.memory_space<vmem>>, vector<32x128xf32>
    %cst_8 = arith.constant dense<0.000000e+00> : vector<2x128xf32>
    %8 = tpu.matmul %6, %7, %cst_8 {dimension_numbers = #tpu.dot_dimension_numbers<[1], [0], [0], [1], [0, 0, 1, 1], [], []>} : vector<2x32xf32>, vector<32x128xf32>, vector<2x128xf32> -> vector<2x128xf32>
    %c0_9 = arith.constant 0 : index
    %c0_10 = arith.constant 0 : index
    %9 = vector.load %arg5[%c0_9, %c0_10] : memref<1x128xf32, #tpu.memory_space<vmem>>, vector<1x128xf32>
    %10 = vector.broadcast %9 : vector<1x128xf32> to vector<2x128xf32>
    %11 = arith.addf %8, %10 : vector<2x128xf32>
    %cst_11 = arith.constant 0.000000e+00 : f32
    %12 = vector.broadcast %cst_11 : f32 to vector<2x128xf32>
    %13 = arith.maximumf %11, %12 : vector<2x128xf32>
    %c0_12 = arith.constant 0 : index
    %c0_13 = arith.constant 0 : index
    %14 = vector.load %arg6[%c0_12, %c0_13] : memref<128x128xf32, #tpu.memory_space<vmem>>, vector<128x128xf32>
    %cst_14 = arith.constant dense<0.000000e+00> : vector<2x128xf32>
    %15 = tpu.matmul %13, %14, %cst_14 {dimension_numbers = #tpu.dot_dimension_numbers<[1], [0], [0], [1], [0, 0, 1, 1], [], []>} : vector<2x128xf32>, vector<128x128xf32>, vector<2x128xf32> -> vector<2x128xf32>
    %c0_15 = arith.constant 0 : index
    %c0_16 = arith.constant 0 : index
    %16 = vector.load %arg7[%c0_15, %c0_16] : memref<1x128xf32, #tpu.memory_space<vmem>>, vector<1x128xf32>
    %17 = vector.broadcast %16 : vector<1x128xf32> to vector<2x128xf32>
    %18 = arith.addf %15, %17 : vector<2x128xf32>
    %cst_17 = arith.constant 0.000000e+00 : f32
    %19 = vector.broadcast %cst_17 : f32 to vector<2x128xf32>
    %20 = arith.maximumf %18, %19 : vector<2x128xf32>
    %c0_18 = arith.constant 0 : index
    %c0_19 = arith.constant 0 : index
    %21 = vector.load %arg8[%c0_18, %c0_19] : memref<128x64xf32, #tpu.memory_space<vmem>>, vector<128x64xf32>
    %cst_20 = arith.constant dense<0.000000e+00> : vector<2x64xf32>
    %22 = tpu.matmul %20, %21, %cst_20 {dimension_numbers = #tpu.dot_dimension_numbers<[1], [0], [0], [1], [0, 0, 1, 1], [], []>} : vector<2x128xf32>, vector<128x64xf32>, vector<2x64xf32> -> vector<2x64xf32>
    %c0_21 = arith.constant 0 : index
    %c0_22 = arith.constant 0 : index
    %23 = vector.load %arg9[%c0_21, %c0_22] : memref<1x64xf32, #tpu.memory_space<vmem>>, vector<1x64xf32>
    %24 = vector.broadcast %23 : vector<1x64xf32> to vector<2x64xf32>
    %25 = arith.addf %22, %24 : vector<2x64xf32>
    %26 = vector.extract_strided_slice %25 {offsets = [0, 0], sizes = [2, 32], strides = [1, 1]} : vector<2x64xf32> to vector<2x32xf32>
    %27 = arith.mulf %26, %26 : vector<2x32xf32>
    %cst_23 = arith.constant dense<0.000000e+00> : vector<2xf32>
    %28 = vector.multi_reduction <add>, %27, %cst_23 [1] : vector<2x32xf32> to vector<2xf32>
    %29 = vector.shape_cast %28 : vector<2xf32> to vector<2x1xf32>
    %cst_24 = arith.constant 1.000000e-24 : f32
    %30 = vector.broadcast %cst_24 : f32 to vector<2x1xf32>
    %31 = arith.maximumf %29, %30 : vector<2x1xf32>
    %32 = math.rsqrt %31 : vector<2x1xf32>
    %33 = vector.broadcast %32 : vector<2x1xf32> to vector<2x32xf32>
    %34 = arith.mulf %26, %33 : vector<2x32xf32>
    %35 = vector.extract_strided_slice %25 {offsets = [0, 32], sizes = [2, 32], strides = [1, 1]} : vector<2x64xf32> to vector<2x32xf32>
    %36 = arith.mulf %35, %35 : vector<2x32xf32>
    %cst_25 = arith.constant dense<0.000000e+00> : vector<2xf32>
    %37 = vector.multi_reduction <add>, %36, %cst_25 [1] : vector<2x32xf32> to vector<2xf32>
    %38 = vector.shape_cast %37 : vector<2xf32> to vector<2x1xf32>
    %cst_26 = arith.constant 1.000000e-24 : f32
    %39 = vector.broadcast %cst_26 : f32 to vector<2x1xf32>
    %40 = arith.maximumf %38, %39 : vector<2x1xf32>
    %41 = math.rsqrt %40 : vector<2x1xf32>
    %42 = vector.broadcast %41 : vector<2x1xf32> to vector<2x32xf32>
    %43 = arith.mulf %35, %42 : vector<2x32xf32>
    %44 = tpu.concatenate %34, %43 in 1 : vector<2x32xf32>, vector<2x32xf32> -> vector<2x64xf32>
    %c0_27 = arith.constant 0 : index
    %c0_28 = arith.constant 0 : index
    %c0_29 = arith.constant 0 : index
    %45 = vector.load %arg10[%c0_27, %c0_28, %c0_29] : memref<1x2x64xf32, #tpu.memory_space<vmem>>, vector<1x2x64xf32>
    %46 = vector.shape_cast %45 : vector<1x2x64xf32> to vector<2x64xf32>
    %47 = vector.shape_cast %44 : vector<2x64xf32> to vector<1x2x64xf32>
    tpu.vector_store %arg10[%c0_27, %c0_28, %c0_29], %47 {strides = array<i32>} : memref<1x2x64xf32, #tpu.memory_space<vmem>>, vector<1x2x64xf32>,
    return
  }
  func.func @transform_0(%arg0: i32) -> (i32, i32, i32) {
    %c0_i32 = arith.constant 0 : i32
    %c0_i32_0 = arith.constant 0 : i32
    %c0_i32_1 = arith.constant 0 : i32
    return %arg0, %c0_i32, %c0_i32_0 : i32, i32, i32
  }
  func.func @transform_1(%arg0: i32) -> (i32, i32) {
    %c0_i32 = arith.constant 0 : i32
    %c0_i32_0 = arith.constant 0 : i32
    %c0_i32_1 = arith.constant 0 : i32
    return %c0_i32, %c0_i32_0 : i32, i32
  }
  func.func @transform_2(%arg0: i32) -> (i32, i32) {
    %c0_i32 = arith.constant 0 : i32
    %c0_i32_0 = arith.constant 0 : i32
    %c0_i32_1 = arith.constant 0 : i32
    return %c0_i32, %c0_i32_0 : i32, i32
  }
  func.func @transform_3(%arg0: i32) -> (i32, i32) {
    %c0_i32 = arith.constant 0 : i32
    %c0_i32_0 = arith.constant 0 : i32
    %c0_i32_1 = arith.constant 0 : i32
    return %c0_i32, %c0_i32_0 : i32, i32
  }
  func.func @transform_4(%arg0: i32) -> (i32, i32) {
    %c0_i32 = arith.constant 0 : i32
    %c0_i32_0 = arith.constant 0 : i32
    %c0_i32_1 = arith.constant 0 : i32
    return %c0_i32, %c0_i32_0 : i32, i32
  }
  func.func @transform_5(%arg0: i32) -> (i32, i32) {
    %c0_i32 = arith.constant 0 : i32
    %c0_i32_0 = arith.constant 0 : i32
    %c0_i32_1 = arith.constant 0 : i32
    return %c0_i32, %c0_i32_0 : i32, i32
  }
  func.func @transform_6(%arg0: i32) -> (i32, i32) {
    %c0_i32 = arith.constant 0 : i32
    %c0_i32_0 = arith.constant 0 : i32
    %c0_i32_1 = arith.constant 0 : i32
    return %c0_i32, %c0_i32_0 : i32, i32
  }
  func.func @transform_7(%arg0: i32) -> (i32, i32) {
    %c0_i32 = arith.constant 0 : i32
    %c0_i32_0 = arith.constant 0 : i32
    %c0_i32_1 = arith.constant 0 : i32
    return %c0_i32, %c0_i32_0 : i32, i32
  }
  func.func @transform_8(%arg0: i32) -> (i32, i32) {
    %c0_i32 = arith.constant 0 : i32
    %c0_i32_0 = arith.constant 0 : i32
    %c0_i32_1 = arith.constant 0 : i32
    return %c0_i32, %c0_i32_0 : i32, i32
  }
  func.func @transform_9(%arg0: i32) -> (i32, i32, i32) {
    %c0_i32 = arith.constant 0 : i32
    %c0_i32_0 = arith.constant 0 : i32
    %c0_i32_1 = arith.constant 0 : i32
    return %arg0, %c0_i32, %c0_i32_0 : i32, i32, i32
  }
}

</mosaic_0001>

<bundles_post_ra>
// kernel: tpu_custom_call.1
= control target key start
LH: loop header
LB: loop body
LE: loop exit
PB: predicated region body
PF: predicated region fallthrough
CT: control target
= control target key end

     0   :  { %14 = vsyncpa [#allocation3], 0  ;;  %s1435_s0 = inlined_call_operand.vmem [shape: f32[2,2,48], index: 0, kind: input, shape index: {}]   ;;  %s1436_s1 = inlined_call_operand.vmem [shape: f32[48,32], index: 1, kind: input, shape index: {}]   ;;  %s1437_s2 = inlined_call_operand.vmem [shape: f32[1,32], index: 2, kind: input, shape index: {}]   ;;  %s1438_s3 = inlined_call_operand.vmem [shape: f32[32,128], index: 3, kind: input, shape index: {}]   ;;  %s1439_s4 = inlined_call_operand.vmem [shape: f32[1,128], index: 4, kind: input, shape index: {}]   ;;  %s1440_s5 = inlined_call_operand.vmem [shape: f32[128,128], index: 5, kind: input, shape index: {}]   ;;  %s1441_s6 = inlined_call_operand.vmem [shape: f32[1,128], index: 6, kind: input, shape index: {}]   ;;  %s1442_s7 = inlined_call_operand.vmem [shape: f32[128,64], index: 7, kind: input, shape index: {}]   ;;  %s1443_s8 = inlined_call_operand.vmem [shape: f32[1,64], index: 8, kind: input, shape index: {}]   ;;  %s1444_s9 = inlined_call_operand.hbm [shape: f32[2,2,64], index: 9, kind: output, shape index: {}]  }
   0x1   :  { %16 = vsyncpa [#allocation3 + $0x1], 0  ;;  %s1170_s30 = smov 0   ;;  %s1172_s10 = smov 0  }
   0x2   :  { %s1174_s11 = smov 0   ;;  %s1176_s12 = smov 0  }
   0x3 LB: > { %s1191_s13 = sadd.s32 4294967295, %s1113_s12   ;;  %s783_s14 = sadd.s32 4294967294, %s1113_s12   ;;  %s1113_s12 = sphi %s1176_s12, %s1450_s12   ;;  %s1109_s11 = sphi %s1174_s11, %s1449_s11   ;;  %s1105_s10 = sphi %s1172_s10, %s1448_s10   ;;  %s1101_s30 = sphi %s1170_s30, %s1447_s30  }
   0x4   : > { %s1195_s15 = sadd.s32 1, %s1113_s12   ;;  %s223_s16 = sadd.s32 1, %s1109_s11 }
   0x5   : > { %s220_s17 = ssub.s32 %s1113_s12, %s1195_s15  ;;  %p233_p0 = scmp.ne.s32.totalorder %s1109_s11, %s1105_s10 }
   0x6   : > { %p221_p1 = scmp.eq.s32.totalorder %s220_s17, 0  ;;  %p234_p2 = scmp.eq.s32.totalorder %s1191_s13, 1 }
   0x7   : > { %p239_p3 = scmp.ne.s32.totalorder %s1105_s10, %s1101_s30  ;;  %p240_p4 = scmp.eq.s32.totalorder %s783_s14, 1 }
   0x8   : > { %s1206_s18 = scalar_select %p221_p1, %s1109_s11, %s223_s16  }
   0x9   : > { %p1208_p5 = por %p234_p2, %p233_p0  ;;  %p1212_p6 = por %p240_p4, %p239_p3 }
   0xa   : > { %p786_p7 = scmp.ge.s32.totalorder %s1113_s12, 1  ;;  %p289_p8 = scmp.lt.s32.totalorder %s1113_s12, 3 }
   0xc   : > { %p290_p9 = pnand %p786_p7, %p289_p8 }
   0xd   : > { %v329_v0 = vld [vmem:[%s1436_s1] sm:$0xff] (!%p290_p9)  ;;  %v330_v1 = vld [vmem:[%s1436_s1 + $0x8] sm:$0xff] (!%p290_p9)  ;;  %v331_v2 = vld [vmem:[%s1436_s1 + $0x10] sm:$0xff] (!%p290_p9)  ;;  %v1115_v3 = vmov (!%p290_p9), 0.0|0.0   ;;  %vm1116_vm0 = vmmov (!%p290_p9), 0   ;;  %v1117_v6 = vmov (!%p290_p9), 0.0  }
   0xe   : > { %293 = sbr.rel (%p290_p9) target bundleno = 1177 (0x499), region = 56  ;;  %941 = vmatprep.subr.bf16.mxu0 (!%p290_p9), %v1115_v3  ;;  %v942_v4 = vpack.c.bf16 (!%p290_p9), %v330_v1, %v329_v0  ;;  %v332_v5 = vld [vmem:[%s1436_s1 + $0x18] sm:$0xff] (!%p290_p9)  ;;  %857 = vmatprep.mubr.msk.f32.mxu0 (!%p290_p9), %vm1116_vm0, %v1117_v6  ;;  %p324_p10 = scmp.lt.s32.totalorder (!%p290_p9), %s1191_s13, 1  ;;  %v416_v7 = vld [vmem:[%s1438_s3] sm:$0xff] (!%p290_p9)  ;;  %v417_v8 = vld [vmem:[%s1438_s3 + $0x8] sm:$0xff] (!%p290_p9)  ;;  %vm342_vm1 = vcmask (!%p290_p9), 392192  }
   0xf   : > { %950 = vmatprep.subr.bf16.mxu1 (!%p290_p9), %v1115_v3  ;;  %868 = vmatprep.mubr.msk.f32.mxu1 (!%p290_p9), %vm1116_vm0, %v1117_v6  ;;  %v945_v9 = vpack.c.bf16 (!%p290_p9), %v332_v5, %v331_v2  ;;  %v951_v10 = vpack.c.bf16 (!%p290_p9), %v417_v8, %v416_v7  ;;  %v333_v11 = vld [vmem:[%s1436_s1 + $0x20] sm:$0xff] (!%p290_p9)  ;;  %v334_v12 = vld [vmem:[%s1436_s1 + $0x28] sm:$0xff] (!%p290_p9)  ;;  %v418_v15 = vld [vmem:[%s1438_s3 + $0x10] sm:$0xff] (!%p290_p9)  ;;  %vm427_vm2 = vcmask (!%p290_p9), 261120   ;;  %s1118_s22 = smov (!%p290_p9), 96   ;;  %vm690_vm3 = vcmask (!%p290_p9), 254976  }
  0x10   : > { %943 = vmatpush3.bf16.msra.mxu0 (!%p290_p9), %v942_v4  ;;  %v948_v13 = vpack.c.bf16 (!%p290_p9), %v334_v12, %v333_v11  ;;  %v419_v16 = vld [vmem:[%s1438_s3 + $0x18] sm:$0xff] (!%p290_p9)  ;;  %v502_v18 = vld [vmem:[%s1440_s5] sm:$0xff] (!%p290_p9)  ;;  %v503_v19 = vld [vmem:[%s1440_s5 + $0x8] sm:$0xff] (!%p290_p9)  ;;  %s321_s23 = sand.u32 (!%p290_p9), 1, %s1105_s10   ;;  %s796_s25 = sshll.u32 (!%p290_p9), %s1191_s13, 5  ;;  %vm708_vm4 = vcmask (!%p290_p9), 517120  }
  0x11   : > { %944 = vmatprep.subr.bf16.mxu0 (!%p290_p9), %v1115_v3  ;;  %952 = vmatpush3.bf16.msra.mxu1 (!%p290_p9), %v951_v10  ;;  %v954_v17 = vpack.c.bf16 (!%p290_p9), %v419_v16, %v418_v15  ;;  %v789_v20 = vld [vmem:[%s1437_s2] ss:$0 sm:$0xff] (!%p290_p9)  ;;  %v957_v22 = vpack.c.bf16 (!%p290_p9), %v503_v19, %v502_v18  ;;  %v504_v25 = vld [vmem:[%s1440_s5 + $0x10] sm:$0xff] (!%p290_p9)  ;;  %v505_v26 = vld [vmem:[%s1440_s5 + $0x18] sm:$0xff] (!%p290_p9)  ;;  %s787_s24 = sshll.u32 (!%p290_p9), %s321_s23, 1  ;;  %s1392_s14 = scalar_lea.hbm (!%p290_p9), %s1444_s9, %s796_s25 }
  0x12   : > { %953 = vmatprep.subr.bf16.mxu1 (!%p290_p9), %v1115_v3  ;;  %v960_v27 = vpack.c.bf16 (!%p290_p9), %v505_v26, %v504_v25  ;;  %v506_v28 = vld [vmem:[%s1440_s5 + $0x20] sm:$0xff] (!%p290_p9)  ;;  %v507_v29 = vld [vmem:[%s1440_s5 + $0x28] sm:$0xff] (!%p290_p9)  ;;  %v508_v31 = vld [vmem:[%s1440_s5 + $0x30] sm:$0xff] (!%p290_p9)  ;;  %s1119_s17 = smov (!%p290_p9), [#allocation2]  }
  0x13   : > { %v963_v30 = vpack.c.bf16 (!%p290_p9), %v507_v29, %v506_v28  ;;  %v509_v32 = vld [vmem:[%s1440_s5 + $0x38] sm:$0xff] (!%p290_p9)  ;;  %v510_v34 = vld [vmem:[%s1440_s5 + $0x40] sm:$0xff] (!%p290_p9)  ;;  %v511_v35 = vld [vmem:[%s1440_s5 + $0x48] sm:$0xff] (!%p290_p9) }
  0x14   : > { %946 = vmatpush3.bf16.msra.mxu0 (!%p290_p9), %v945_v9  ;;  %v966_v33 = vpack.c.bf16 (!%p290_p9), %v509_v32, %v508_v31  ;;  %v969_v36 = vpack.c.bf16 (!%p290_p9), %v511_v35, %v510_v34  ;;  %v512_v37 = vld [vmem:[%s1440_s5 + $0x50] sm:$0xff] (!%p290_p9)  ;;  %v513_v38 = vld [vmem:[%s1440_s5 + $0x58] sm:$0xff] (!%p290_p9)  ;;  %v514_v40 = vld [vmem:[%s1440_s5 + $0x60] sm:$0xff] (!%p290_p9) }
  0x15   : > { %s325_s21 = scalar_select %p324_p10, %s1191_s13, 1  ;;  %947 = vmatprep.subr.bf16.mxu0 %v1115_v3  ;;  %955 = vmatpush3.bf16.msra.mxu1 %v954_v17  ;;  %v972_v39 = vpack.c.bf16 %v513_v38, %v512_v37  ;;  %v515_v41 = vld [vmem:[%s1440_s5 + $0x68] sm:$0xff]  ;;  %v516_v43 = vld [vmem:[%s1440_s5 + $0x70] sm:$0xff]  ;;  %v517_v44 = vld [vmem:[%s1440_s5 + $0x78] sm:$0xff] }
  0x16   : > { %956 = vmatprep.subr.bf16.mxu1 %v1115_v3  ;;  %v975_v42 = vpack.c.bf16 %v515_v41, %v514_v40  ;;  %v978_v45 = vpack.c.bf16 %v517_v44, %v516_v43  ;;  %v596_v46 = vld [vmem:[%s1442_s7] sm:$0xff]  ;;  %v597_v47 = vld [vmem:[%s1442_s7 + $0x8] sm:$0xff]  ;;  %v598_v48 = vld [vmem:[%s1442_s7 + $0x10] sm:$0xff]  ;;  %s711_s13 = scalar_lea.sflag [#allocation3], %s321_s23 }
  0x17   : > { %s788_s26 = sshll.u32 %s325_s21, 1  ;;  %v981_v49 = vpack.c.bf16 %v597_v47, %v596_v46  ;;  %v599_v50 = vld [vmem:[%s1442_s7 + $0x18] sm:$0xff]  ;;  %v600_v52 = vld [vmem:[%s1442_s7 + $0x20] sm:$0xff]  ;;  %v601_v53 = vld [vmem:[%s1442_s7 + $0x28] sm:$0xff]  ;;  %s1055_s21 = sshll.u32 %s1119_s17, 4  ;;  %s1056_s21 = int_to_ptr.vmem [resolvable:$false] %s1055_s21 }
  0x18   : > { %s327_s29 = scalar_lea.vmem %s1435_s0, %s788_s26  ;;  %949 = vmatpush3.bf16.msra.mxu0 %v948_v13  ;;  %v984_v51 = vpack.c.bf16 %v599_v50, %v598_v48  ;;  %v987_v54 = vpack.c.bf16 %v601_v53, %v600_v52  ;;  %v602_v55 = vld [vmem:[%s1442_s7 + $0x30] sm:$0xff]  ;;  %v603_v56 = vld [vmem:[%s1442_s7 + $0x38] sm:$0xff]  ;;  %v604_v58 = vld [vmem:[%s1442_s7 + $0x40] sm:$0xff]  ;;  %s323_s26 = scalar_lea.vmem [#allocation2], %s787_s24 }
  0x19   : > { %v328_v14 = vld [vmem:[%s327_s29] sm:$0x3]  ;;  %980 = vmatprep.subr.bf16.mxu0 %v1115_v3  ;;  %v990_v57 = vpack.c.bf16 %v603_v56, %v602_v55  ;;  %v605_v59 = vld [vmem:[%s1442_s7 + $0x48] sm:$0xff]  ;;  %v606_v61 = vld [vmem:[%s1442_s7 + $0x50] sm:$0xff]  ;;  %s724_s27 = sshll.u32 %s323_s26, 4  ;;  %s1394_s27 = int_to_ptr.vmem [resolvable:$true] %s724_s27 }
  0x1a   : > { %v993_v60 = vpack.c.bf16 %v605_v59, %v604_v58  ;;  %v607_v62 = vld [vmem:[%s1442_s7 + $0x58] sm:$0xff]  ;;  %v608_v0 = vld [vmem:[%s1442_s7 + $0x60] sm:$0xff]  ;;  %v609_v1 = vld [vmem:[%s1442_s7 + $0x68] sm:$0xff]  ;;  %s1051_s16 = scalar_lea.vmem %s1394_s27, 32  ;;  %p1058_p0 = scmp.lt.s32.totalorder %s1394_s27, %s1056_s21 }
  0x1b   : > { %858 = vmatmul.mubr.msk.f32.vlgmr.msra.gmra.mrb[0].mxu0 %vm342_vm1, %v328_v14  ;;  %v996_v63 = vpack.c.bf16 %v607_v62, %v606_v61  ;;  %v999_v2 = vpack.c.bf16 %v609_v1, %v608_v0  ;;  %v791_v4 = vld [vmem:[%s1439_s4] ss:$0 sm:$0xff]  ;;  %v610_v9 = vld [vmem:[%s1442_s7 + $0x70] sm:$0xff]  ;;  %v611_v10 = vld [vmem:[%s1442_s7 + $0x78] sm:$0xff]  ;;  %p1052_p11 = scmp.ne.s32.totalorder %s1394_s27, %s1051_s16 }
  0x1c   : > { %938 = vmatprep.mubr.msk.f32.mxu0 %vm1116_vm0, %v1117_v6  ;;  %982 = vmatpush3.bf16.msra.mxu0 %v981_v49  ;;  %v1002_v11 = vpack.c.bf16 %v611_v10, %v610_v9  ;;  %v794_v16 = vld [vmem:[%s1443_s8] ss:$0 sm:$0xff] }
  0x1d   : > { %983 = vmatprep.subr.bf16.mxu0 %v1115_v3  ;;  %p1053_p12 = pnand %p1052_p11, %p1208_p5 }
  0x1f   : > { %p1054_p13 = pneg %p1053_p12 }
  0x20   : > { %985 = vmatpush3.bf16.msra.mxu0 %v984_v51 }
  0x21   : > { %986 = vmatprep.subr.bf16.mxu0 %v1115_v3 }
  0x24   : > { %988 = vmatpush3.bf16.msra.mxu0 %v987_v54 }
  0x25   : > { %989 = vmatprep.subr.bf16.mxu0 %v1115_v3 }
  0x28   : > { %991 = vmatpush3.bf16.msra.mxu0 %v990_v57 }
  0x29   : > { %992 = vmatprep.subr.bf16.mxu0 %v1115_v3 }
  0x2c   : > { %994 = vmatpush3.bf16.msra.mxu0 %v993_v60 }
  0x2d   : > { %995 = vmatprep.subr.bf16.mxu0 %v1115_v3 }
  0x30   : > { %997 = vmatpush3.bf16.msra.mxu0 %v996_v63 }
  0x31   : > { %998 = vmatprep.subr.bf16.mxu0 %v1115_v3 }
  0x34   : > { %1000 = vmatpush3.bf16.msra.mxu0 %v999_v2 }
  0x35   : > { %1001 = vmatprep.subr.bf16.mxu0 %v1115_v3 }
  0x38   : > { %1003 = vmatpush3.bf16.msra.mxu0 %v1002_v11 }
  0xee   : > { %v412_v21 = vpop.f32.mrb[0].mxu0 }
  0xef   : > { %v413_v23 = vadd.f32 %v789_v20, %v412_v21  ;;  %v859_v24 = vpop.f32.mrb[1].mxu0 }
  0xf1   : > { %869 = vmatmul.mubr.msk.f32.vlgmr.msra.gmra.mrb[0].mxu1 %vm427_vm2, %v413_v23 }
  0xf2   : > { %958 = vmatpush3.bf16.msra.mxu1 %v957_v22  ;;  %903 = vmatprep.mubr.msk.f32.mxu1 %vm1116_vm0, %v1117_v6 }
  0xf3   : > { %959 = vmatprep.subr.bf16.mxu1 %v1115_v3 }
  0xf6   : > { %961 = vmatpush3.bf16.msra.mxu1 %v960_v27 }
  0xf7   : > { %962 = vmatprep.subr.bf16.mxu1 %v1115_v3 }
  0xfa   : > { %964 = vmatpush3.bf16.msra.mxu1 %v963_v30 }
  0xfb   : > { %965 = vmatprep.subr.bf16.mxu1 %v1115_v3 }
  0xfe   : > { %967 = vmatpush3.bf16.msra.mxu1 %v966_v33 }
  0xff   : > { %968 = vmatprep.subr.bf16.mxu1 %v1115_v3 }
 0x102   : > { %970 = vmatpush3.bf16.msra.mxu1 %v969_v36 }
 0x103   : > { %971 = vmatprep.subr.bf16.mxu1 %v1115_v3 }
 0x106   : > { %973 = vmatpush3.bf16.msra.mxu1 %v972_v39 }
 0x107   : > { %974 = vmatprep.subr.bf16.mxu1 %v1115_v3 }
 0x10a   : > { %976 = vmatpush3.bf16.msra.mxu1 %v975_v42 }
 0x10b   : > { %977 = vmatprep.subr.bf16.mxu1 %v1115_v3  ;;  %v793_v3 = vld [vmem:[%s1441_s6] ss:$0 sm:$0xff] }
 0x10e   : > { %979 = vmatpush3.bf16.msra.mxu1 %v978_v45 }
 0x1c4   : > { %v497_v5 = vpop.f32.mrb[0].mxu1 }
 0x1c5   : > { %v498_v6 = vadd.f32 %v791_v4, %v497_v5  ;;  %v870_v7 = vpop.f32.mrb[1].mxu1 }
 0x1c7   : > { %v501_v8 = vmax.f32 %v498_v6, 0.0 }
 0x1c9   : > { %904 = vmatmul.mubr.f32.vlgmr.msra.gmra.mrb[2].mxu1 %v501_v8 }
 0x29c   : > { %v591_v12 = vpop.f32.mrb[2].mxu1 }
 0x29d   : > { %v592_v13 = vadd.f32 %v793_v3, %v591_v12  ;;  %v905_v14 = vpop.f32.mrb[3].mxu1 }
 0x29f   : > { %v595_v15 = vmax.f32 %v592_v13, 0.0 }
 0x2a1   : > { %939 = vmatmul.mubr.f32.vlgmr.msra.gmra.mrb[2].mxu0 %v595_v15 }
 0x374   : > { %v685_v17 = vpop.f32.mrb[2].mxu0 }
 0x375   : > { %v686_v18 = vadd.f32 %v794_v16, %v685_v17  ;;  %v940_v19 = vpop.f32.mrb[3].mxu0 }
 0x377   : > { %v689_v20 = vmul.f32 %v686_v18, %v686_v18 }
 0x379   : > { %698 = vrot.lane.b32.xlu0 %v689_v20, %s1118_s22  ;;  %v691_v21 = vsel %vm690_vm3, %v689_v20, 0.0  ;;  %s1057_s22 = scalar_lea.vmem %s1056_s21, 64 }
 0x37a   : > { %p1059_p1 = scmp.lt.s32.totalorder %s1057_s22, %s1051_s16 }
 0x37c   : > { %p1060_p2 = por %p1059_p1, %p1058_p0 }
 0x37e   : > { %p1061_p3 = pnand %p1060_p2, %p1054_p13 }
 0x398   : > { %692 = vadd.xlane.f32.xlu0 %v691_v21 }
 0x3eb   : > { %v699_v22 = vpop.permute.xlu0 %698 }
 0x3ec   : > { %v701_v23 = vsel %vm690_vm3, %v699_v22, 0.0 }
 0x3ed   : > { %702 = vadd.xlane.f32.xlu1 %v701_v23 }
 0x425   : > { %v693_v24 = vpop.xlane.xlu0 %692 }
 0x426   : > { %v694_v25 = vmax.f32 %v693_v24, 1e-24 }
 0x428   : > { %1047 = vrsqrt.f32 %v694_v25 }
 0x432   : > { %v1048_v28 = vpop.eup %1047 }
 0x433   : > { %v696_v30 = vmul.f32 %v1048_v28, %v686_v18 }
 0x47a   : > { %v703_v26 = vpop.xlane.xlu1 %702 }
 0x47b   : > { %v704_v27 = vmax.f32 %v703_v26, 1e-24 }
 0x47d   : > { %1049 = vrsqrt.f32 %v704_v27 }
 0x487   : > { %v1050_v29 = vpop.eup %1049 }
 0x488   : > { %v706_v31 = vmul.f32 %v1050_v29, %v686_v18 }
 0x48a   : > { %v707_v32 = vsel %vm427_vm2, %v696_v30, %v706_v31 }
 0x48b   : > { %709 = vst.msk [vmem:[%s323_s26] sm:$0x3] %vm708_vm4, %v707_v32 }
 0x48c   : > { %1064 = shalt.err (!%p1061_p3)
}
 0x48d   : > { %s1065_s23 = scalar_lea.hbm %s1392_s14, 32  ;;  %s1069_s26 = scalar_lea.hbm %s1444_s9, 64 }
 0x48e   : > { %p1066_p4 = scmp.ne.s32.totalorder %s1392_s14, %s1065_s23  ;;  %p1070_p9 = scmp.lt.u32.totalorder %s1392_s14, %s1444_s9 }
 0x48f   : > { %p1071_p10 = scmp.lt.u32.totalorder %s1069_s26, %s1065_s23  ;;  %p1073_p12 = scmp.lt.u32.totalorder %s1065_s23, %s1392_s14 }
 0x490   : > { %p1067_p7 = pnand %p1066_p4, %p1208_p5 }
 0x491   : > { %p1072_p11 = por %p1071_p10, %p1070_p9 }
 0x492   : > { %p1068_p8 = pneg %p1067_p7 }
 0x493   : > { %p1074_p13 = por %p1073_p12, %p1072_p11 }
 0x495   : > { %p1075_p0 = pnand %p1074_p13, %p1068_p8 }
 0x497   : > { %1078 = shalt.err (!%p1075_p0)
}
 0x498   : > { %1004 = dma.vmem_to_hbm [thread:$0]  (%p1208_p5), %s1394_s27, 32, %s1392_s14, %s711_s13  }
 0x499 PF: > { %p1010_p1 = scmp.ge.s32.totalorder %s1113_s12, 2  ;;  %s736_s16 = sand.u32 1, %s1101_s30  }
 0x49a   : > { %s737_s17 = scalar_lea.sflag [#allocation3], %s736_s16 }
 0x49b   : > { %p1007_p2 = pnand %p1010_p1, %p1212_p6 }
 0x49d   : > { %1096 = dma.done.wait (!%p1007_p2), %s737_s17, 32  }
 0x49e   : > { %1098 = vsyncadd (!%p1007_p2), %s737_s17, 4294967264  ;;  %p19_p3 = scmp.ge.s32.totalorder %s1195_s15, 4   ;;  %s1447_s30 = smov %s1105_s10 }
 0x49f   : > { %s1448_s10 = smov %s1109_s11  ;;  %s1449_s11 = smov %s1206_s18 }
 0x4a0   : > { %s1450_s12 = smov %s1195_s15  ;;  %21 = sbr.rel (!%p19_p3) target bundleno = 3 (0x3), region = 91 }
 0x4a7   :  { %742 = vsyncpa [#allocation3], 1 }
 0x4a8   :  { %744 = vsyncpa [#allocation3 + $0x1], 1 }

</bundles_post_ra>
